<compile_context>
chip_gen: v6e
topology: v6e:2x2x1
jax: 0.10.0
libtpu: 0.0.40
codegen_flags: <defaults>
</compile_context>

<pallas_src>
import functools

import jax
import jax.numpy as jnp
from jax.experimental import pallas as pl
from jax.experimental.pallas import tpu as pltpu


def _ce_tile_kernel(pred_ref, tgt_ref, out_ref, *, hw, tile_hw):
    """One (C, tile_hw) logits tile -> one (8, 128) output tile holding the tile's
    summed NLL at [0, 0] (zeros elsewhere)."""
    j = pl.program_id(1)

    p = pred_ref[...].astype(jnp.float32)   # (C, tile_hw): classes x spatial positions
    t = tgt_ref[...]                        # (1, tile_hw) int32 labels

    # numerically stable log-sum-exp over the class (sublane) axis
    m = jnp.max(p, axis=0, keepdims=True)                              # (1, tile_hw)
    lse = m + jnp.log(jnp.sum(jnp.exp(p - m), axis=0, keepdims=True))  # (1, tile_hw)

    # "gather" the target-class logit via an iota compare (no cross-lane gather)
    row = jax.lax.broadcasted_iota(jnp.int32, p.shape, 0)              # (C, tile_hw)
    sel = jnp.sum(jnp.where(row == t, p, 0.0), axis=0, keepdims=True)  # (1, tile_hw)
    # TODO(synk): labels outside [0, C) (e.g. PyTorch ignore_index=-100) are not masked.

    per_sample = lse - sel                                             # (1, tile_hw)

    # mask the tail tile (positions past H*W)
    pos = j * tile_hw + jax.lax.broadcasted_iota(jnp.int32, (1, tile_hw), 1)
    per_sample = jnp.where(pos < hw, per_sample, 0.0)

    partial = jnp.sum(per_sample)                                      # scalar f32

    # write the partial into a lane/sublane-aligned output tile (unmasked vst)
    r = jax.lax.broadcasted_iota(jnp.int32, (8, 128), 0)
    c = jax.lax.broadcasted_iota(jnp.int32, (8, 128), 1)
    out_ref[...] = jnp.where((r == 0) & (c == 0), partial, 0.0)


def as2d_cross_entropy(prediction, target):
    """prediction: (N, C, H, W) float; target: (N, H, W) int -> scalar mean NLL."""
    N, C, H, W = prediction.shape
    assert target.shape == (N, H, W)
    HW = H * W
    M = N * HW

    # Free reshapes only (NCHW stays NCHW); the permute(0,2,3,1) of the PyTorch module
    # is fused into the kernel's classes-on-sublanes / spatial-on-lanes layout.
    pred3d = prediction.reshape(N, C, HW)
    tgt3d = target.reshape(N, 1, HW).astype(jnp.int32)

    # ---- tile sizing against this generation's VMEM ------------------------------
    try:
        vmem_cap = int(pltpu.get_tpu_info().vmem_capacity_bytes)
    except Exception:
        vmem_cap = 64 * 1024 * 1024          # conservative fallback (v7x per-TC)
    buffer_budget = min(vmem_cap // 2, 32 * 1024 * 1024)

    itemsize = jnp.dtype(prediction.dtype).itemsize
    bytes_per_pos = C * itemsize + 4          # one logits column + one int32 label
    max_tile = buffer_budget // (2 * bytes_per_pos)            # double-buffered inputs
    target_tile = (4 * 1024 * 1024) // max(C * itemsize, 1)    # ~4 MiB logits tile
    tile_hw = max(128, (min(max_tile, target_tile) // 128) * 128)
    if tile_hw >= HW:
        tile_hw = HW                          # single block covering the full axis
    grid_hw = pl.cdiv(HW, tile_hw)

    vmem_needed = 2 * tile_hw * bytes_per_pos + 2 * 8 * 128 * 4
    vmem_limit = int(min(max(vmem_needed + (2 << 20), 16 << 20),
                         vmem_cap - (8 << 20)))

    kernel = functools.partial(_ce_tile_kernel, hw=HW, tile_hw=tile_hw)

    partials = pl.pallas_call(
        kernel,
        out_shape=jax.ShapeDtypeStruct((N * 8, grid_hw * 128), jnp.float32),
        grid_spec=pltpu.PrefetchScalarGridSpec(
            num_scalar_prefetch=0,
            grid=(N, grid_hw),
            in_specs=[
                # (None, ...) squeezes the batch dim; kernel sees (C, tile_hw).
                pl.BlockSpec((None, C, tile_hw), lambda n, j: (n, 0, j)),
                pl.BlockSpec((None, 1, tile_hw), lambda n, j: (n, 0, j)),
            ],
            out_specs=pl.BlockSpec((8, 128), lambda n, j: (n, j)),
        ),
        compiler_params=pltpu.CompilerParams(
            dimension_semantics=("parallel", "parallel"),
            vmem_limit_bytes=vmem_limit,
        ),
    )(pred3d, tgt3d)

    # tree-sum of the per-tile partials + mean scale, once, outside the kernel
    return jnp.sum(partials) / M


def _reference_loss(prediction, target):
    """Plain-JAX reference of As2DCriterion(CrossEntropyLoss())."""
    N, C, H, W = prediction.shape
    p = jnp.transpose(prediction, (0, 2, 3, 1)).reshape(-1, C).astype(jnp.float32)
    t = target.reshape(-1).astype(jnp.int32)
    logz = jax.scipy.special.logsumexp(p, axis=-1)
    sel = jnp.take_along_axis(p, t[:, None], axis=-1)[:, 0]
    return jnp.mean(logz - sel)


if __name__ == "__main__":
    key = jax.random.PRNGKey(0)
    k1, k2 = jax.random.split(key)

    N, C, H, W = 2, 4, 16, 16
    prediction = jax.random.normal(k1, (N, C, H, W), dtype=jnp.float32)
    target = jax.random.randint(k2, (N, H, W), minval=0, maxval=C, dtype=jnp.int32)

    loss = as2d_cross_entropy(prediction, target)
    jax.block_until_ready(loss)

    ref = _reference_loss(prediction, target)
    assert jnp.allclose(loss, ref, atol=1e-5, rtol=1e-5), (loss, ref)

    print("KERNEL_OK")
</pallas_src>

<mosaic_0001>
module attributes {stable_mosaic.version = 11 : i64} {
  func.func @_ce_tile_kernel(%arg0: i32, %arg1: i32, %arg2: memref<1x4x256xf32, #tpu.memory_space<vmem>>, %arg3: memref<1x1x256xi32, #tpu.memory_space<vmem>>, %arg4: memref<8x128xf32, #tpu.memory_space<vmem>>) attributes {dimension_semantics = [#tpu.dimension_semantics<parallel>, #tpu.dimension_semantics<parallel>], iteration_bounds = array<i64: 2, 1>, scalar_prefetch = 0 : i64, scratch_operands = 0 : i64, tpu.core_type = #tpu.core_type<tc>, window_params = [{transform_indices = @transform_0, window_bounds = array<i64: 1, 4, 256>}, {transform_indices = @transform_1, window_bounds = array<i64: 1, 1, 256>}, {transform_indices = @transform_2, window_bounds = array<i64: 8, 128>}]} {
    %c0 = arith.constant 0 : index
    %c0_0 = arith.constant 0 : index
    %c0_1 = arith.constant 0 : index
    %0 = vector.load %arg2[%c0, %c0_0, %c0_1] : memref<1x4x256xf32, #tpu.memory_space<vmem>>, vector<1x4x256xf32>
    %1 = vector.shape_cast %0 : vector<1x4x256xf32> to vector<4x256xf32>
    %c0_2 = arith.constant 0 : index
    %c0_3 = arith.constant 0 : index
    %c0_4 = arith.constant 0 : index
    %2 = vector.load %arg3[%c0_2, %c0_3, %c0_4] : memref<1x1x256xi32, #tpu.memory_space<vmem>>, vector<1x1x256xi32>
    %3 = vector.shape_cast %2 : vector<1x1x256xi32> to vector<1x256xi32>
    %cst = arith.constant dense<0xFF800000> : vector<256xf32>
    %4 = vector.multi_reduction <maximumf>, %1, %cst [0] : vector<4x256xf32> to vector<256xf32>
    %5 = vector.shape_cast %4 : vector<256xf32> to vector<1x256xf32>
    %6 = vector.broadcast %5 : vector<1x256xf32> to vector<4x256xf32>
    %7 = arith.subf %1, %6 : vector<4x256xf32>
    %8 = math.exp %7 : vector<4x256xf32>
    %cst_5 = arith.constant dense<0.000000e+00> : vector<256xf32>
    %9 = vector.multi_reduction <add>, %8, %cst_5 [0] : vector<4x256xf32> to vector<256xf32>
    %10 = vector.shape_cast %9 : vector<256xf32> to vector<1x256xf32>
    %11 = math.log %10 : vector<1x256xf32>
    %12 = arith.addf %5, %11 : vector<1x256xf32>
    %13 = tpu.iota {dimensions = array<i32: 0>} : vector<4x256xi32>
    %14 = vector.broadcast %3 : vector<1x256xi32> to vector<4x256xi32>
    %15 = arith.cmpi eq, %13, %14 : vector<4x256xi32>
    %cst_6 = arith.constant 0.000000e+00 : f32
    %16 = vector.broadcast %cst_6 : f32 to vector<4x256xf32>
    %17 = arith.select %15, %1, %16 : vector<4x256xi1>, vector<4x256xf32>
    %cst_7 = arith.constant dense<0.000000e+00> : vector<256xf32>
    %18 = vector.multi_reduction <add>, %17, %cst_7 [0] : vector<4x256xf32> to vector<256xf32>
    %19 = vector.shape_cast %18 : vector<256xf32> to vector<1x256xf32>
    %20 = arith.subf %12, %19 : vector<1x256xf32>
    %c256_i32 = arith.constant 256 : i32
    %21 = arith.muli %arg1, %c256_i32 : i32
    %22 = tpu.iota {dimensions = array<i32: 1>} : vector<1x256xi32>
    %23 = vector.broadcast %21 : i32 to vector<1x256xi32>
    %24 = arith.addi %23, %22 : vector<1x256xi32>
    %c256_i32_8 = arith.constant 256 : i32
    %25 = vector.broadcast %c256_i32_8 : i32 to vector<1x256xi32>
    %26 = arith.cmpi slt, %24, %25 : vector<1x256xi32>
    %cst_9 = arith.constant 0.000000e+00 : f32
    %27 = vector.broadcast %cst_9 : f32 to vector<1x256xf32>
    %28 = arith.select %26, %20, %27 : vector<1x256xi1>, vector<1x256xf32>
    %29 = vector.shape_cast %28 : vector<1x256xf32> to vector<1x1x256xf32>
    %cst_10 = arith.constant dense<0.000000e+00> : vector<1xf32>
    %30 = vector.multi_reduction <add>, %29, %cst_10 [1, 2] : vector<1x1x256xf32> to vector<1xf32>
    %31 = vector.shape_cast %30 : vector<1xf32> to vector<1x1x1xf32>
    %32 = vector.extract %31[0, 0, 0] : f32 from vector<1x1x1xf32>
    %33 = tpu.iota {dimensions = array<i32: 0>} : vector<8x128xi32>
    %34 = tpu.iota {dimensions = array<i32: 1>} : vector<8x128xi32>
    %c0_i32 = arith.constant 0 : i32
    %35 = vector.broadcast %c0_i32 : i32 to vector<8x128xi32>
    %36 = arith.cmpi eq, %33, %35 : vector<8x128xi32>
    %c0_i32_11 = arith.constant 0 : i32
    %37 = vector.broadcast %c0_i32_11 : i32 to vector<8x128xi32>
    %38 = arith.cmpi eq, %34, %37 : vector<8x128xi32>
    %39 = arith.andi %36, %38 : vector<8x128xi1>
    %cst_12 = arith.constant 0.000000e+00 : f32
    %40 = vector.broadcast %32 : f32 to vector<8x128xf32>
    %41 = vector.broadcast %cst_12 : f32 to vector<8x128xf32>
    %42 = arith.select %39, %40, %41 : vector<8x128xi1>, vector<8x128xf32>
    %c0_13 = arith.constant 0 : index
    %c0_14 = arith.constant 0 : index
    %43 = vector.load %arg4[%c0_13, %c0_14] : memref<8x128xf32, #tpu.memory_space<vmem>>, vector<8x128xf32>
    tpu.vector_store %arg4[%c0_13, %c0_14], %42 {strides = array<i32>} : memref<8x128xf32, #tpu.memory_space<vmem>>, vector<8x128xf32>,
    return
  }
  func.func @transform_0(%arg0: i32, %arg1: i32) -> (i32, i32, i32) {
    %c0_i32 = arith.constant 0 : i32
    %c0_i32_0 = arith.constant 0 : i32
    return %arg0, %c0_i32, %arg1 : i32, i32, i32
  }
  func.func @transform_1(%arg0: i32, %arg1: i32) -> (i32, i32, i32) {
    %c0_i32 = arith.constant 0 : i32
    %c0_i32_0 = arith.constant 0 : i32
    return %arg0, %c0_i32, %arg1 : i32, i32, i32
  }
  func.func @transform_2(%arg0: i32, %arg1: i32) -> (i32, i32) {
    %c0_i32 = arith.constant 0 : i32
    return %arg0, %arg1 : i32, i32
  }
}

</mosaic_0001>

<bundles_post_ra>
// kernel: tpu_custom_call.1
= control target key start
LH: loop header
LB: loop body
LE: loop exit
PB: predicated region body
PF: predicated region fallthrough
CT: control target
= control target key end

     0   :  { %7 = vsyncpa [#allocation3], 0  ;;  %s900_s0 = inlined_call_operand.hbm [shape: f32[2,4,256], index: 0, kind: input, shape index: {}]   ;;  %s901_s1 = inlined_call_operand.hbm [shape: s32[2,1,256], index: 1, kind: input, shape index: {}]   ;;  %s902_s2 = inlined_call_operand.hbm [shape: f32[16,128], index: 2, kind: output, shape index: {}]  }
   0x1   :  { %9 = vsyncpa [#allocation3 + $0x1], 0 }
   0x2   :  { %10 = vsyncpa [#allocation6], 0 }
   0x3   :  { %12 = vsyncpa [#allocation6 + $0x1], 0 }
   0x4   :  { %13 = vsyncpa [#allocation4], 0 }
   0x5   :  { %15 = vsyncpa [#allocation4 + $0x1], 0  ;;  %s711_s9 = smov 0   ;;  %s713_s10 = smov 0  }
   0x6   :  { %s715_s11 = smov 0   ;;  %s717_s12 = smov 0  }
   0x7   :  { %s719_s13 = smov 0   ;;  %s721_s14 = smov 0  }
   0x8 LB: > { %s455_s15 = sadd.s32 4294967295, %s691_s14   ;;  %s456_s16 = sadd.s32 4294967294, %s691_s14   ;;  %s691_s14 = sphi %s721_s14, %s21_s14   ;;  %s687_s13 = sphi %s719_s13, %s914_s13   ;;  %s683_s12 = sphi %s717_s12, %s913_s12   ;;  %s679_s11 = sphi %s715_s11, %s912_s11   ;;  %s675_s10 = sphi %s713_s10, %s911_s10   ;;  %s671_s9 = sphi %s711_s9, %s910_s9  }
   0x9   : > { %s33_s17 = sadd.s32 1, %s687_s13  ;;  %s42_s18 = sadd.s32 1, %s679_s11 }
   0xa   : > { %p35_p0 = scmp.ge.s32.totalorder %s33_s17, 2  ;;  %p49_p1 = scmp.ne.s32.totalorder %s679_s11, %s675_s10 }
   0xb   : > { %p50_p2 = scmp.eq.s32.totalorder %s691_s14, 0  ;;  %p55_p3 = scmp.ne.s32.totalorder %s675_s10, %s671_s9 }
   0xc   : > { %s916_s17 = smov (%p35_p0, %s33_s17), 0  ;;  %p56_p5 = scmp.eq.s32.totalorder %s455_s15, 0 }
   0xd   : > { %p752_p4 = por %p50_p2, %p49_p1  ;;  %s37_s20 = ssub.s32 %s687_s13, %s916_s17 }
   0xe   : > { %p109_p6 = scmp.eq.s32.totalorder %s455_s15, 1  ;;  %p40_p7 = scmp.eq.s32.totalorder %s37_s20, 0 }
   0xf   : > { %p758_p8 = por %p56_p5, %p55_p3  ;;  %p115_p10 = scmp.eq.s32.totalorder %s456_s16, 1 }
  0x10   : > { %p762_p9 = por %p109_p6, %p49_p1  ;;  %p494_p13 = scmp.lt.s32.totalorder %s691_s14, 2 }
  0x11   : > { %s767_s23 = scalar_select %p40_p7, %s679_s11, %s42_s18  }
  0x12   : > { %p769_p11 = por %p115_p10, %p55_p3  ;;  %s776_s25 = sand.u32 1, %s679_s11  }
  0x13   : > { %s459_s26 = sshll.u32 %s776_s25, 3  ;;  %s473_s27 = sshll.u32 %s687_s13, 7 }
  0x14   : > { %s147_s30 = scalar_lea.hbm %s900_s0, %s473_s27  ;;  %s139_s3 = scalar_lea.vmem [#allocation2], %s459_s26 }
  0x15   : > { %s149_s4 = sshll.u32 %s139_s3, 4  ;;  %p785_p0 = pnand %p494_p13, %p752_p4  ;;  %s150_s4 = int_to_ptr.vmem [resolvable:$true] %s149_s4 }
  0x16   : > { %p465_p1 = scmp.ge.s32.totalorder %s691_s14, 1  ;;  %p175_p2 = scmp.lt.s32.totalorder %s691_s14, 3 }
  0x17   : > { %s136_s6 = scalar_lea.sflag [#allocation3], %s776_s25  ;;  %p553_p3 = pneg %p785_p0 }
  0x18   : > { %s564_s7 = scalar_lea.vmem %s150_s4, 128  ;;  %s693_s8 = smov [#allocation2]  }
  0x19   : > { %p565_p5 = scmp.ne.s32.totalorder %s150_s4, %s564_s7  ;;  %s569_s15 = sshll.u32 %s693_s8, 4  ;;  %s570_s15 = int_to_ptr.vmem [resolvable:$false] %s569_s15 }
  0x1a   : > { %s571_s16 = scalar_lea.vmem %s570_s15, 256  ;;  %p572_p4 = scmp.lt.s32.totalorder %s150_s4, %s570_s15 }
  0x1b   : > { %p567_p6 = pnand %p565_p5, %p553_p3  ;;  %p573_p10 = scmp.lt.s32.totalorder %s571_s16, %s564_s7 }
  0x1d   : > { %p568_p7 = pneg %p567_p6  ;;  %p574_p13 = por %p573_p10, %p572_p4 }
  0x1f   : > { %p575_p12 = pnand %p574_p13, %p568_p7 }
  0x21   : > { %578 = shalt.err (!%p575_p12)
}
  0x22   : > { %486 = dma.hbm_to_vmem [thread:$0]  (!%p785_p0), %s147_s30, 128, %s150_s4, %s136_s6  }
  0x23   : > { %p803_p5 = pnand %p465_p1, %p175_p2  ;;  %s462_s19 = sshll.u32 %s776_s25, 1 }
  0x24   : > { %s474_s20 = sshll.u32 %s687_s13, 5  ;;  %s160_s29 = scalar_lea.vmem [#allocation5], %s462_s19 }
  0x25   : > { %s168_s28 = scalar_lea.hbm %s901_s1, %s474_s20  ;;  %s170_s3 = sshll.u32 %s160_s29, 4  ;;  %s171_s3 = int_to_ptr.vmem [resolvable:$true] %s170_s3 }
  0x26   : > { %s157_s7 = scalar_lea.sflag [#allocation6], %s776_s25  ;;  %s592_s8 = scalar_lea.vmem %s171_s3, 32 }
  0x27   : > { %p593_p12 = scmp.ne.s32.totalorder %s171_s3, %s592_s8  ;;  %s694_s30 = smov [#allocation5]  }
  0x28   : > { %s597_s4 = sshll.u32 %s694_s30, 4  ;;  %s598_s4 = int_to_ptr.vmem [resolvable:$false] %s597_s4 }
  0x29   : > { %p595_p6 = pnand %p593_p12, %p553_p3  ;;  %s599_s6 = scalar_lea.vmem %s598_s4, 64 }
  0x2a   : > { %p600_p1 = scmp.lt.s32.totalorder %s171_s3, %s598_s4  ;;  %p601_p2 = scmp.lt.s32.totalorder %s599_s6, %s592_s8 }
  0x2b   : > { %p596_p7 = pneg %p595_p6 }
  0x2c   : > { %p602_p4 = por %p601_p2, %p600_p1 }
  0x2e   : > { %p603_p10 = pnand %p602_p4, %p596_p7 }
  0x30   : > { %606 = shalt.err (!%p603_p10)
}
  0x31   : > { %489 = dma.hbm_to_vmem [thread:$0]  (!%p785_p0), %s168_s28, 32, %s171_s3, %s157_s7  }
  0x32   : > { %179 = sbr.rel (%p803_p5) target bundleno = 348 (0x15c), region = 28  ;;  %s821_s25 = sand.u32 (!%p803_p5), 1, %s675_s10  }
  0x33   : > { %s466_s15 = sshll.u32 (!%p803_p5), %s821_s25, 3  ;;  %s182_s16 = scalar_lea.sflag (!%p803_p5), [#allocation3], %s821_s25 }
  0x34   : > { %s185_s19 = scalar_lea.vmem (!%p803_p5), [#allocation2], %s466_s15 }
  0x37   : > { %658 = dma.done.wait (%p758_p8), %s182_s16, 128  }
  0x38   : > { %660 = vsyncadd (%p758_p8), %s182_s16, 4294967168  ;;  %s467_s5 = sshll.u32 %s821_s25, 1  ;;  %s191_s18 = scalar_lea.sflag [#allocation6], %s821_s25 }
  0x39   : > { %s194_s20 = scalar_lea.vmem [#allocation5], %s467_s5 }
  0x3a   : > { %662 = dma.done.wait (%p758_p8), %s191_s18, 32  }
  0x3b   : > { %664 = vsyncadd (%p758_p8), %s191_s18, 4294967264  ;;  %vm227_vm0 = vcmask 1043456   ;;  %v222_v0 = vld [vmem:[%s185_s19] sm:$0xff]  ;;  %v272_v18 = vlaneseq  ;;  %v223_v22 = vld [vmem:[%s194_s20] sm:$0x3]  ;;  %vm313_vm3 = vcmask 1040384  }
  0x3c   : > { %v225_v1 = vcombine.high %v222_v0, %v222_v0  ;;  %v228_v2 = vsel %vm227_vm0, %v222_v0, -inf  ;;  %s470_s21 = sshll.u32 %s683_s12, 7  ;;  %s219_s26 = scalar_lea.vmem [#allocation7], %s466_s15 }
  0x3d   : > { %v229_v3 = vrot.slane %v228_v2, 4  ;;  %v840_v20 = vshrl.u32 %v272_v18, 7  ;;  %s347_s27 = sshll.u32 %s219_s26, 4  ;;  %s858_s7 = scalar_lea.hbm %s902_s2, %s470_s21  ;;  %s348_s27 = int_to_ptr.vmem [resolvable:$true] %s347_s27 }
  0x3e   : > { %v235_v4 = vsel %vm227_vm0, %v225_v1, -inf  ;;  %s333_s8 = scalar_lea.sflag [#allocation4], %s821_s25  ;;  %s607_s30 = scalar_lea.vmem %s348_s27, 128 }
  0x3f   : > { %v230_v5 = vmax.f32 %v228_v2, %v229_v3  ;;  %v236_v6 = vrot.slane %v235_v4, 4  ;;  %v276_v21 = vsub.s32 0, %v840_v20  ;;  %v280_v23 = vsub.s32 1, %v840_v20  ;;  %p608_p8 = scmp.ne.s32.totalorder %s348_s27, %s607_s30  ;;  %s695_s12 = smov [#allocation7]  }
  0x40   : > { %vm326_vm4 = vcmp.eq.s32.totalorder %v840_v20, 0  ;;  %s611_s4 = sshll.u32 %s695_s12, 4  ;;  %s612_s4 = int_to_ptr.vmem [resolvable:$false] %s611_s4 }
  0x41   : > { %v231_v7 = vrot.slane %v230_v5, 2  ;;  %v237_v8 = vmax.f32 %v235_v4, %v236_v6  ;;  %v277_v24 = vrot.slane %v223_v22, %v276_v21  ;;  %v281_v25 = vrot.slane %v223_v22, %v280_v23  ;;  %p609_p0 = pnand %p608_p8, %p762_p9  ;;  %s613_s6 = scalar_lea.vmem %s612_s4, 256 }
  0x42   : > { %p614_p13 = scmp.lt.s32.totalorder %s348_s27, %s612_s4  ;;  %p615_p5 = scmp.lt.s32.totalorder %s613_s6, %s607_s30 }
  0x43   : > { %v232_v9 = vmax.f32 %v230_v5, %v231_v7  ;;  %v238_v10 = vrot.slane %v237_v8, 2  ;;  %vm282_vm1 = vcmp.eq.s32.totalorder %v840_v20, %v277_v24  ;;  %vm283_vm2 = vcmp.eq.s32.totalorder %v840_v20, %v281_v25  ;;  %p610_p3 = pneg %p609_p0 }
  0x44   : > { %v284_v30 = vsel %vm282_vm1, %v222_v0, 0.0  ;;  %v285_v34 = vsel %vm283_vm2, %v225_v1, 0.0  ;;  %p616_p12 = por %p615_p5, %p614_p13 }
  0x45   : > { %v233_v11 = vrot.slane %v232_v9, 1  ;;  %v239_v12 = vmax.f32 %v237_v8, %v238_v10  ;;  %v286_v35 = vsel %vm227_vm0, %v284_v30, 0.0  ;;  %v293_v38 = vsel %vm227_vm0, %v285_v34, 0.0 }
  0x46   : > { %v287_v41 = vrot.slane %v286_v35, 4  ;;  %v294_v44 = vrot.slane %v293_v38, 4  ;;  %p617_p6 = pnand %p616_p12, %p610_p3 }
  0x47   : > { %v234_v13 = vmax.f32 %v232_v9, %v233_v11  ;;  %v240_v14 = vrot.slane %v239_v12, 1 }
  0x48   : > { %v288_v47 = vadd.f32 %v287_v41, %v286_v35  ;;  %v295_v49 = vadd.f32 %v294_v44, %v293_v38 }
  0x49   : > { %v241_v15 = vmax.f32 %v239_v12, %v240_v14  ;;  %v304_v12 = vand.u32 127, %v272_v18 }
  0x4a   : > { %v289_v50 = vrot.slane %v288_v47, 2  ;;  %v296_v51 = vrot.slane %v295_v49, 2 }
  0x4b   : > { %v244_v16 = vcombine.low %v234_v13, %v241_v15  ;;  %vm327_vm5 = vcmp.eq.s32.totalorder %v304_v12, 0 }
  0x4c   : > { %v290_v52 = vadd.f32 %v289_v50, %v288_v47  ;;  %v297_v53 = vadd.f32 %v296_v51, %v295_v49  ;;  %vm328_vm6 = vmand %vm326_vm4, %vm327_vm5 }
  0x4d   : > { %v246_v17 = vsub.f32 %v222_v0, %v244_v16 }
  0x4e   : > { %v291_v54 = vrot.slane %v290_v52, 1  ;;  %v298_v55 = vrot.slane %v297_v53, 1 }
  0x4f   : > { %v247_v19 = vmul.f32 1.442695, %v246_v17 }
  0x50   : > { %v292_v58 = vadd.f32 %v291_v54, %v290_v52  ;;  %v299_v62 = vadd.f32 %v298_v55, %v297_v53 }
  0x51   : > { %545 = vpow2.f32 %v247_v19 }
  0x5e   : > { %v546_v26 = vpop.eup %545 }
  0x5f   : > { %v250_v27 = vcombine.high %v546_v26, %v546_v26  ;;  %v252_v28 = vsel %vm227_vm0, %v546_v26, 0.0 }
  0x60   : > { %v253_v29 = vrot.slane %v252_v28, 4 }
  0x61   : > { %v259_v31 = vsel %vm227_vm0, %v250_v27, 0.0 }
  0x62   : > { %v254_v32 = vadd.f32 %v253_v29, %v252_v28  ;;  %v260_v33 = vrot.slane %v259_v31, 4 }
  0x64   : > { %v255_v36 = vrot.slane %v254_v32, 2  ;;  %v261_v37 = vadd.f32 %v260_v33, %v259_v31 }
  0x66   : > { %v256_v39 = vadd.f32 %v255_v36, %v254_v32  ;;  %v262_v40 = vrot.slane %v261_v37, 2 }
  0x68   : > { %v257_v42 = vrot.slane %v256_v39, 1  ;;  %v263_v43 = vadd.f32 %v262_v40, %v261_v37 }
  0x6a   : > { %v258_v45 = vadd.f32 %v257_v42, %v256_v39  ;;  %v264_v46 = vrot.slane %v263_v43, 1 }
  0x6c   : > { %v265_v48 = vadd.f32 %v264_v46, %v263_v43  ;;  %547 = vlog2.f32 %v258_v45 }
  0x6e   : > { %549 = vlog2.f32 %v265_v48 }
  0x79   : > { %v548_v56 = vpop.eup %547 }
  0x7a   : > { %v267_v57 = vmul.f32 0.6931472, %v548_v56 }
  0x7b   : > { %v550_v59 = vpop.eup %549 }
  0x7c   : > { %v269_v60 = vmul.f32 0.6931472, %v550_v59  ;;  %v270_v61 = vadd.f32 %v267_v57, %v234_v13 }
  0x7e   : > { %v271_v63 = vadd.f32 %v269_v60, %v241_v15  ;;  %v300_v0 = vsub.f32 %v270_v61, %v292_v58 }
  0x80   : > { %v301_v1 = vsub.f32 %v271_v63, %v299_v62  ;;  %v314_v2 = vsel %vm313_vm3, %v300_v0, 0.0 }
  0x82   : > { %v315_v3 = vsel %vm313_vm3, %v301_v1, 0.0 }
  0x83   : > { %v316_v4 = vadd.f32 %v315_v3, %v314_v2 }
  0x85   : > { %317 = vadd.xlane.f32.xlu0 %v316_v4 }
 0x10e   : > { %v318_v5 = vpop.xlane.xlu0 %317 }
 0x10f   : > { %v319_v6 = vrot.slane %v318_v5, 4 }
 0x111   : > { %v320_v7 = vadd.f32 %v319_v6, %v318_v5 }
 0x113   : > { %v321_v8 = vrot.slane %v320_v7, 2 }
 0x115   : > { %v322_v9 = vadd.f32 %v321_v8, %v320_v7 }
 0x117   : > { %v323_v10 = vrot.slane %v322_v9, 1 }
 0x119   : > { %v324_v11 = vadd.f32 %v323_v10, %v322_v9 }
 0x11b   : > { %475 = vpush %v324_v11 }
 0x14c   : > { %s476_s28 = spop %475 }
 0x14d   : > { %v329_v13 = vstv %s476_s28 }
 0x14e   : > { %v330_v14 = vsel %vm328_vm6, %v329_v13, 0.0 }
 0x14f   : > { %331 = vst [vmem:[%s219_s26] sm:$0xff] %v330_v14 }
 0x150   : > { %620 = shalt.err (!%p617_p6)
}
 0x151   : > { %s621_s15 = scalar_lea.hbm %s858_s7, 128  ;;  %s625_s19 = scalar_lea.hbm %s902_s2, 256 }
 0x152   : > { %p622_p7 = scmp.ne.s32.totalorder %s858_s7, %s621_s15  ;;  %p626_p4 = scmp.lt.s32.totalorder %s858_s7, %s902_s2 }
 0x153   : > { %p627_p10 = scmp.lt.s32.totalorder %s625_s19, %s621_s15 }
 0x154   : > { %p623_p1 = pnand %p622_p7, %p762_p9 }
 0x155   : > { %p628_p8 = por %p627_p10, %p626_p4 }
 0x156   : > { %p624_p2 = pneg %p623_p1 }
 0x158   : > { %p629_p0 = pnand %p628_p8, %p624_p2 }
 0x15a   : > { %632 = shalt.err (!%p629_p0)
}
 0x15b   : > { %481 = dma.vmem_to_hbm [thread:$0]  (%p762_p9), %s348_s27, 128, %s858_s7, %s333_s8  }
 0x15c PF: > { %s359_s20 = sand.u32 1, %s671_s9   ;;  %p909_p3 = scmp.ge.s32.totalorder %s691_s14, 2 }
 0x15d   : > { %s360_s21 = scalar_lea.sflag [#allocation4], %s359_s20 }
 0x15e   : > { %p491_p13 = pnand %p909_p3, %p769_p11 }
 0x160   : > { %p492_p5 = pneg %p491_p13 }
 0x162   : > { %666 = dma.done.wait (%p492_p5), %s360_s21, 128  }
 0x163   : > { %668 = vsyncadd (%p492_p5), %s360_s21, 4294967168  ;;  %s21_s14 = sadd.s32 1, %s691_s14   ;;  %s910_s9 = smov %s675_s10 }
 0x164   : > { %p18_p12 = scmp.ge.s32.totalorder %s21_s14, 4   ;;  %s911_s10 = smov %s679_s11 }
 0x165   : > { %s912_s11 = smov %s767_s23  ;;  %s913_s12 = smov %s687_s13 }
 0x166   : > { %s914_s13 = smov %s916_s17  ;;  %20 = sbr.rel (!%p18_p12) target bundleno = 8 (0x8), region = 86 }
 0x16b   :  { %365 = vsyncpa [#allocation3], 1 }
 0x16c   :  { %367 = vsyncpa [#allocation3 + $0x1], 1 }
 0x16d   :  { %368 = vsyncpa [#allocation6], 1 }
 0x16e   :  { %370 = vsyncpa [#allocation6 + $0x1], 1 }
 0x16f   :  { %371 = vsyncpa [#allocation4], 1 }
 0x170   :  { %373 = vsyncpa [#allocation4 + $0x1], 1 }

</bundles_post_ra>
